<compile_context>
chip_gen: v5e
topology: v5e:2x2
jax: 0.10.0
libtpu: 0.0.40
codegen_flags: <defaults>
</compile_context>

<pallas_src>
import jax
import jax.numpy as jnp
from jax.experimental import pallas as pl
from jax.experimental.pallas import tpu as pltpu

NUM_COPIES = 10  # cat([v1] * 10, dim=1)


def _mm_cat_kernel(x1_ref, x2rep_ref, o_ref):
    # mm(x1, x2) with K == 1 is the outer product x1[:, 0:1] * x2[0:1, :].
    # x2rep is x2 already replicated 10x along columns, so the mm + 10-way
    # concat collapse to a single fused VPU broadcast multiply and one store.
    a = x1_ref[...].astype(jnp.float32)      # (M, 1)
    b = x2rep_ref[...].astype(jnp.float32)   # (1, 10*N)
    o_ref[...] = (a * b).astype(o_ref.dtype)


def mm_cat(x1: jax.Array, x2: jax.Array) -> jax.Array:
    M, K = x1.shape
    K2, N = x2.shape
    assert K == 1 and K2 == 1, "kernel specialized for the module's K == 1 shapes"
    NO = NUM_COPIES * N

    # Replicate x2 columns outside the kernel (same DMA size class; with
    # allow_input_fusion XLA may fuse this producer straight into the call).
    x2_rep = jnp.tile(x2, (1, NUM_COPIES))   # (1, 10*N)

    itemsize = jnp.dtype(x1.dtype).itemsize
    cost = pl.CostEstimate(
        flops=2 * M * NO,
        bytes_accessed=(M * K + K * NO + M * NO) * itemsize,
        transcendentals=0,
    )

    return pl.pallas_call(
        _mm_cat_kernel,
        out_shape=jax.ShapeDtypeStruct((M, NO), x1.dtype),
        in_specs=[
            pl.BlockSpec(memory_space=pltpu.MemorySpace.VMEM),
            pl.BlockSpec(memory_space=pltpu.MemorySpace.VMEM),
        ],
        out_specs=pl.BlockSpec(memory_space=pltpu.MemorySpace.VMEM),
        cost_estimate=cost,
        compiler_params=pltpu.CompilerParams(
            allow_input_fusion=[True, True],
        ),
    )(x1, x2_rep)


mm_cat_jit = jax.jit(mm_cat)


def mm_cat_ref(x1, x2):
    v1 = x1 @ x2
    return jnp.concatenate([v1] * NUM_COPIES, axis=1)


if __name__ == "__main__":
    key = jax.random.PRNGKey(0)
    k1, k2 = jax.random.split(key)
    # Shapes implied by the module: x1 (2, 1), x2 (1, 3)
    x1 = jax.random.normal(k1, (2, 1), dtype=jnp.float32)
    x2 = jax.random.normal(k2, (1, 3), dtype=jnp.float32)

    out = mm_cat_jit(x1, x2)
    out = jax.block_until_ready(out)

    ref = mm_cat_ref(x1, x2)
    assert out.shape == (2, 30), out.shape
    assert jnp.allclose(out, ref, atol=1e-5, rtol=1e-5), (out, ref)

    print("KERNEL_OK")
</pallas_src>

<mosaic_0001>
module attributes {stable_mosaic.version = 11 : i64} {
  func.func @_mm_cat_kernel(%arg0: memref<2x1xf32, #tpu.memory_space<vmem>>, %arg1: memref<1x30xf32, #tpu.memory_space<vmem>>, %arg2: memref<2x30xf32, #tpu.memory_space<vmem>>) attributes {dimension_semantics = [], scalar_prefetch = 0 : i64, scratch_operands = 0 : i64, tpu.core_type = #tpu.core_type<tc>} {
    %c0 = arith.constant 0 : index
    %c0_0 = arith.constant 0 : index
    %0 = vector.load %arg0[%c0, %c0_0] : memref<2x1xf32, #tpu.memory_space<vmem>>, vector<2x1xf32>
    %c0_1 = arith.constant 0 : index
    %c0_2 = arith.constant 0 : index
    %1 = vector.load %arg1[%c0_1, %c0_2] : memref<1x30xf32, #tpu.memory_space<vmem>>, vector<1x30xf32>
    %2 = vector.broadcast %0 : vector<2x1xf32> to vector<2x30xf32>
    %3 = vector.broadcast %1 : vector<1x30xf32> to vector<2x30xf32>
    %4 = arith.mulf %2, %3 : vector<2x30xf32>
    %c0_3 = arith.constant 0 : index
    %c0_4 = arith.constant 0 : index
    %5 = vector.load %arg2[%c0_3, %c0_4] : memref<2x30xf32, #tpu.memory_space<vmem>>, vector<2x30xf32>
    tpu.vector_store %arg2[%c0_3, %c0_4], %4 {strides = array<i32>} : memref<2x30xf32, #tpu.memory_space<vmem>>, vector<2x30xf32>,
    return
  }
}

</mosaic_0001>

<bundles_post_ra>
// kernel: mm_cat.1
= control target key start
LH: loop header
LB: loop body
LE: loop exit
PB: predicated region body
PF: predicated region fallthrough
CT: control target
= control target key end

     0   :  { %v71_v1 = vmov 0   ;;  %s97_s0 = inlined_call_operand.vmem [shape: f32[2,1], index: 0, kind: input, shape index: {}]   ;;  %s98_s1 = inlined_call_operand.vmem [shape: f32[1,30], index: 1, kind: input, shape index: {}]   ;;  %s99_s2 = inlined_call_operand.hbm [shape: f32[2,30], index: 2, kind: output, shape index: {}]  }
   0x1   :  { %v12_v0 = vld [vmem:[%s97_s0] sm:$0x3]  ;;  %43 = vset.pattern.permute.xlu0 %v71_v1 }
   0x2   :  { %7 = vsyncpa [#allocation3], 0  ;;  %16 = vperm.xlu0 %43, %v12_v0   ;;  %v44_v2 = vld [vmem:[%s98_s1] ss:$0 sm:$0xff]  ;;  %s72_s13 = smov [#allocation2]   ;;  %s32_s17 = sshll.u32 %s99_s2, 4  ;;  %s33_s17 = int_to_ptr.hbm [resolvable:$true] %s32_s17 }
   0x3   :  { %s30_s14 = sshll.u32 %s72_s13, 4  ;;  %vm23_vm0 = vcmask 238592   ;;  %s31_s14 = int_to_ptr.vmem [resolvable:$true] %s30_s14 }
  0x74   :  { %v17_v3 = vpop.permute.xlu0 %16 }
  0x75   :  { %v22_v4 = vmul.f32 %v44_v2, %v17_v3 }
  0x77   :  { %24 = vst.msk [vmem:[#allocation2] sm:$0x3] %vm23_vm0, %v22_v4 }
  0x78   :  { %35 = dma.vmem_to_hbm [thread:$0]  %s31_s14, 32, %s33_s17, [#allocation3]  }
  0x79   :  { %69 = dma.done.wait [#allocation3], 32  }
  0x7a   :  { %70 = vsyncadd [#allocation3], 4294967264 }
  0x7b   :  { %40 = vsyncpa [#allocation3], 1 }

</bundles_post_ra>
